<compile_context>
chip_gen: v7x
topology: tpu7x:2x2x1
jax: 0.10.0
libtpu: 0.0.40
codegen_flags: <defaults>
</compile_context>

<pallas_src>
import functools

import jax
import jax.numpy as jnp
from jax.experimental import pallas as pl
from jax.experimental.pallas import tpu as pltpu


# ---------------------------------------------------------------------------
# Kernels
# ---------------------------------------------------------------------------
def _add_pos_kernel_3d(x_ref, pe_ref, o_ref):
    """x/o: (tile_s, bs, d_model); pe: (tile_s, d_model).

    bs is a multiple of the sublane granule and d_model a multiple of 128 on this
    path, so the blocks are fully dense and Mosaic broadcasts pe across the sublane
    (batch) axis inside the add — no tile-sized temporary is materialized.
    """
    o_ref[...] = (x_ref[...] + pe_ref[...][:, None, :]).astype(o_ref.dtype)


def _add_pos_kernel_lanefold(x_ref, pe_ref, o_ref, *, bs):
    """x/o: (tile_s, bs*d_model); pe: (tile_s, d_model).

    Batch is folded into the lane axis, so sublanes (tile_s) are always dense and
    lanes are dense whenever bs*d_model is a multiple of 128. pe is replicated
    across the batch fold with jnp.tile; the in-VMEM copy is hidden under the DMA.
    """
    pe_rep = jnp.tile(pe_ref[...], (1, bs))          # pe_rep[s, b*D + j] == pe[s, j]
    o_ref[...] = (x_ref[...] + pe_rep).astype(o_ref.dtype)


# ---------------------------------------------------------------------------
# Tiling helpers
# ---------------------------------------------------------------------------
def _round_up(v, m):
    return ((v + m - 1) // m) * m


def _vmem_budgets():
    """(tile_bytes, vmem_limit_bytes) sized to the current TPU generation."""
    try:
        vmem_cap = int(pltpu.get_tpu_info().vmem_capacity_bytes)
    except Exception:  # pragma: no cover - conservative (v7x-sized) fallback
        vmem_cap = 64 * 1024 * 1024
    # Leave roughly half of physical VMEM to the compiler / neighbours.
    vmem_limit = min(vmem_cap // 2, 64 * 1024 * 1024)
    # Working set per step ≈ 2×(x block) + 2×(out block) + (pe temp) + slack.
    tile_bytes = max(1 << 20, (vmem_limit - (4 << 20)) // 6)
    return tile_bytes, vmem_limit


def _choose_tile_s(seq_len, row_bytes, granule, budget_bytes):
    """Largest seq tile whose x block fits `budget_bytes`.

    The tile is a multiple of the sublane granule (or covers the full seq axis), and
    we prefer a nearby granule-multiple that divides seq_len so there is no padded
    final block — but never shrink below half of the byte-budget tile.
    """
    tile_s = max(1, budget_bytes // max(1, row_bytes))
    if tile_s >= seq_len:
        return seq_len
    tile_s = max(granule, (tile_s // granule) * granule)
    tile_s = min(tile_s, seq_len)
    if seq_len % tile_s != 0:
        cand = tile_s
        floor = max(granule, tile_s // 2)
        while cand >= floor:
            if seq_len % cand == 0:
                return cand
            cand -= granule
    return tile_s


def _maybe_split_for_two_cores(tile_s, seq_len, granule, row_bytes):
    """If everything fits one block but the problem is non-trivial, split it in two so
    dimension_semantics=("parallel",) gives both v7x TensorCores work."""
    if (
        tile_s == seq_len
        and seq_len % (2 * granule) == 0
        and seq_len * row_bytes > (1 << 20)
    ):
        return seq_len // 2
    return tile_s


# ---------------------------------------------------------------------------
# Wrapper
# ---------------------------------------------------------------------------
def learned_positional_encoding(
    x, positional_embeddings, *, tile_bytes=None, vmem_limit_bytes=None
):
    """out = positional_embeddings[:seq_len][:, None, :] + x   (x: (S, B, D))."""
    seq_len, bs, d_model = x.shape
    max_len, pe_d = positional_embeddings.shape
    assert pe_d == d_model
    assert seq_len <= max_len, "seq_len can be at most max_len."

    auto_tile, auto_limit = _vmem_budgets()
    if tile_bytes is None:
        tile_bytes = auto_tile
    if vmem_limit_bytes is None:
        vmem_limit_bytes = auto_limit

    # Tiny wrapper-side slice so the pe array's leading dim matches seq_len exactly
    # (keeps every BlockSpec dim either granule-aligned or full-extent). The dtype
    # cast happens in-kernel, for free under the DMA.
    pe = positional_embeddings[:seq_len]

    itemsize = jnp.dtype(x.dtype).itemsize
    granule = max(8, 32 // itemsize)        # sublane granule: 8 f32 / 16 bf16 / 32 int8
    lane = 128

    # Fully dense 3-D path only when it needs no padding at all; otherwise fold the
    # batch into the lane axis (always sublane-dense, lane-dense when B*D % 128 == 0).
    dense_3d = (bs % granule == 0) and (d_model % lane == 0)

    if dense_3d:
        row_bytes = bs * d_model * itemsize                      # exact, no padding
    else:
        row_bytes = _round_up(bs * d_model, lane) * itemsize     # padded lane fold

    tile_s = _choose_tile_s(seq_len, row_bytes, granule, tile_bytes)
    tile_s = _maybe_split_for_two_cores(tile_s, seq_len, granule, row_bytes)
    n_tiles = pl.cdiv(seq_len, tile_s)

    compiler_params = pltpu.CompilerParams(
        dimension_semantics=("parallel",),   # v7x: shard seq tiles across both TCs
        vmem_limit_bytes=vmem_limit_bytes,
    )
    pe_itemsize = jnp.dtype(pe.dtype).itemsize
    cost = pl.CostEstimate(
        flops=seq_len * bs * d_model,
        transcendentals=0,
        bytes_accessed=2 * seq_len * bs * d_model * itemsize
        + seq_len * d_model * pe_itemsize,
    )

    if dense_3d:
        return pl.pallas_call(
            _add_pos_kernel_3d,
            out_shape=jax.ShapeDtypeStruct((seq_len, bs, d_model), x.dtype),
            grid_spec=pltpu.PrefetchScalarGridSpec(
                num_scalar_prefetch=0,
                grid=(n_tiles,),
                in_specs=[
                    pl.BlockSpec((tile_s, bs, d_model), lambda i: (i, 0, 0)),
                    pl.BlockSpec((tile_s, d_model), lambda i: (i, 0)),
                ],
                out_specs=pl.BlockSpec((tile_s, bs, d_model), lambda i: (i, 0, 0)),
            ),
            compiler_params=compiler_params,
            cost_estimate=cost,
        )(x, pe)

    # Lane-fold path: free row-major view (S, B, D) -> (S, B*D).
    x2 = x.reshape(seq_len, bs * d_model)
    out2 = pl.pallas_call(
        functools.partial(_add_pos_kernel_lanefold, bs=bs),
        out_shape=jax.ShapeDtypeStruct((seq_len, bs * d_model), x.dtype),
        grid_spec=pltpu.PrefetchScalarGridSpec(
            num_scalar_prefetch=0,
            grid=(n_tiles,),
            in_specs=[
                pl.BlockSpec((tile_s, bs * d_model), lambda i: (i, 0)),
                pl.BlockSpec((tile_s, d_model), lambda i: (i, 0)),
            ],
            out_specs=pl.BlockSpec((tile_s, bs * d_model), lambda i: (i, 0)),
        ),
        compiler_params=compiler_params,
        cost_estimate=cost,
    )(x2, pe)
    return out2.reshape(seq_len, bs, d_model)


# ---------------------------------------------------------------------------
# Self-test
# ---------------------------------------------------------------------------
if __name__ == "__main__":
    key = jax.random.PRNGKey(0)

    # (seq_len, bs, d_model, max_len, tile_bytes)  — tile_bytes=None -> auto budget.
    cases = [
        (8, 2, 32, 64, None),        # lane-fold path, single block (tiny module shapes)
        (16, 8, 128, 64, None),      # dense 3-D path, single block
        (64, 8, 128, 128, 32 * 1024),   # dense 3-D path, 8-tile pipelined grid
        (64, 2, 32, 128, 2 * 1024),     # lane-fold path, 8-tile grid, bs*D < 128
        (24, 3, 128, 64, 8 * 1024),     # lane-fold path, 3 tiles, lane-dense fold (3*128)
        (20, 8, 128, 64, 16 * 1024),    # dense 3-D path, ragged last block (20 % 8 != 0)
    ]

    for idx, (seq_len, bs, d_model, max_len, tile_bytes) in enumerate(cases):
        key, kx, kp = jax.random.split(key, 3)
        x = jax.random.normal(kx, (seq_len, bs, d_model), dtype=jnp.float32)
        # Deterministic init matching nn.init.normal_(mean=0, std=d_model ** -0.5)
        positional_embeddings = (
            jax.random.normal(kp, (max_len, d_model), dtype=jnp.float32)
            * (d_model ** -0.5)
        )

        ref = positional_embeddings[:seq_len][:, None, :] + x

        out = learned_positional_encoding(
            x, positional_embeddings, tile_bytes=tile_bytes
        )
        out = jax.block_until_ready(out)

        assert out.shape == (seq_len, bs, d_model), f"bad shape (case {idx})"
        assert jnp.allclose(out, ref, atol=1e-6), f"mismatch vs reference (case {idx})"

    print("KERNEL_OK")
</pallas_src>

<mosaic_0001>
module attributes {stable_mosaic.version = 11 : i64} {
  func.func @_add_pos_kernel_lanefold(%arg0: i32, %arg1: memref<8x64xf32, #tpu.memory_space<vmem>>, %arg2: memref<8x32xf32, #tpu.memory_space<vmem>>, %arg3: memref<8x64xf32, #tpu.memory_space<vmem>>) attributes {dimension_semantics = [#tpu.dimension_semantics<parallel>], iteration_bounds = array<i64: 1>, scalar_prefetch = 0 : i64, scratch_operands = 0 : i64, tpu.core_type = #tpu.core_type<tc>, window_params = [{transform_indices = @transform_0, window_bounds = array<i64: 8, 64>}, {transform_indices = @transform_1, window_bounds = array<i64: 8, 32>}, {transform_indices = @transform_2, window_bounds = array<i64: 8, 64>}]} {
    %c0 = arith.constant 0 : index
    %c0_0 = arith.constant 0 : index
    %0 = vector.load %arg2[%c0, %c0_0] : memref<8x32xf32, #tpu.memory_space<vmem>>, vector<8x32xf32>
    %1 = tpu.concatenate %0, %0 in 1 : vector<8x32xf32>, vector<8x32xf32> -> vector<8x64xf32>
    %c0_1 = arith.constant 0 : index
    %c0_2 = arith.constant 0 : index
    %2 = vector.load %arg1[%c0_1, %c0_2] : memref<8x64xf32, #tpu.memory_space<vmem>>, vector<8x64xf32>
    %3 = arith.addf %2, %1 : vector<8x64xf32>
    %c0_3 = arith.constant 0 : index
    %c0_4 = arith.constant 0 : index
    %4 = vector.load %arg3[%c0_3, %c0_4] : memref<8x64xf32, #tpu.memory_space<vmem>>, vector<8x64xf32>
    tpu.vector_store %arg3[%c0_3, %c0_4], %3 {strides = array<i32>} : memref<8x64xf32, #tpu.memory_space<vmem>>, vector<8x64xf32>,
    return
  }
  func.func @transform_0(%arg0: i32) -> (i32, i32) {
    %c0_i32 = arith.constant 0 : i32
    %c0_i32_0 = arith.constant 0 : i32
    return %arg0, %c0_i32 : i32, i32
  }
  func.func @transform_1(%arg0: i32) -> (i32, i32) {
    %c0_i32 = arith.constant 0 : i32
    %c0_i32_0 = arith.constant 0 : i32
    return %arg0, %c0_i32 : i32, i32
  }
  func.func @transform_2(%arg0: i32) -> (i32, i32) {
    %c0_i32 = arith.constant 0 : i32
    %c0_i32_0 = arith.constant 0 : i32
    return %arg0, %c0_i32 : i32, i32
  }
}

</mosaic_0001>

<bundles_post_ra>
// kernel: tpu_custom_call.1
= control target key start
LH: loop header
LB: loop body
LE: loop exit
PB: predicated region body
PF: predicated region fallthrough
CT: control target
= control target key end

     0   :  { %7 = vsyncpa [#allocation3], 0  ;;  %s194_s0 = inlined_call_operand.hbm [shape: f32[8,64], index: 0, kind: input, shape index: {}]   ;;  %s195_s1 = inlined_call_operand.hbm [shape: f32[8,32], index: 1, kind: input, shape index: {}]   ;;  %s196_s2 = inlined_call_operand.hbm [shape: f32[8,64], index: 2, kind: output, shape index: {}]  }
   0x1   :  { %8 = vsyncpa [#allocation6], 0 }
   0x2   :  { %9 = vsyncpa [#allocation4], 0  ;;  %s139_s9 = smov [#allocation2]   ;;  %s140_s11 = smov [#allocation5]  }
   0x3   :  { %s16_s10 = sshll.u32 %s139_s9, 4  ;;  %s26_s12 = sshll.u32 %s140_s11, 4  ;;  %s17_s10 = int_to_ptr.vmem [resolvable:$true] %s16_s10  ;;  %s27_s12 = int_to_ptr.vmem [resolvable:$true] %s26_s12 }
   0x4   :  { %s67_s15 = scalar_lea.hbm %s194_s0, 128 }
   0x5   :  { %p68_p0 = scmp.ne.s32.totalorder %s194_s0, %s67_s15  ;;  %p71_p1 = scmp.lt.u32.totalorder %s67_s15, %s194_s0 }
   0x7   :  { %p73_p2 = pnand %p71_p1, %p68_p0 }
   0x9   :  { %76 = shalt.err (!%p73_p2)
}
   0xa   :  { %s77_s20 = scalar_lea.vmem %s17_s10, 128  ;;  %p82_p4 = scmp.lt.s32.totalorder %s17_s10, %s17_s10 }
   0xb   :  { %p78_p3 = scmp.ne.s32.totalorder %s17_s10, %s77_s20  ;;  %p83_p5 = scmp.lt.s32.totalorder %s77_s20, %s77_s20 }
   0xd   :  { %p84_p6 = por %p83_p5, %p82_p4 }
   0xf   :  { %p85_p7 = pnand %p84_p6, %p78_p3 }
  0x11   :  { %88 = shalt.err (!%p85_p7)
}
  0x12   :  { %19 = dma.hbm_to_vmem [thread:$0]  %s194_s0, 128, %s17_s10, [#allocation3]  }
  0x13   :  { %s89_s25 = scalar_lea.hbm %s195_s1, 128 }
  0x14   :  { %p90_p8 = scmp.ne.s32.totalorder %s195_s1, %s89_s25  ;;  %p93_p9 = scmp.lt.u32.totalorder %s89_s25, %s195_s1 }
  0x16   :  { %p95_p10 = pnand %p93_p9, %p90_p8 }
  0x18   :  { %98 = shalt.err (!%p95_p10)
}
  0x19   :  { %s99_s30 = scalar_lea.vmem %s27_s12, 128  ;;  %p104_p12 = scmp.lt.s32.totalorder %s27_s12, %s27_s12 }
  0x1a   :  { %p100_p11 = scmp.ne.s32.totalorder %s27_s12, %s99_s30  ;;  %p105_p13 = scmp.lt.s32.totalorder %s99_s30, %s99_s30 }
  0x1c   :  { %p106_p0 = por %p105_p13, %p104_p12 }
  0x1e   :  { %p107_p1 = pnand %p106_p0, %p100_p11 }
  0x20   :  { %110 = shalt.err (!%p107_p1)
}
  0x21   :  { %29 = dma.hbm_to_vmem [thread:$0]  %s195_s1, 128, %s27_s12, [#allocation6]  }
  0x22   :  { %133 = dma.done.wait [#allocation3], 128  }
  0x23   :  { %134 = vsyncadd [#allocation3], 4294967168 }
  0x24   :  { %135 = dma.done.wait [#allocation6], 128  }
  0x25   :  { %136 = vsyncadd [#allocation6], 4294967168  ;;  %v36_v0 = vld [vmem:[#allocation5] sm:$0xff]  ;;  %s141_s4 = smov 32   ;;  %vm41_vm0 = vcmask 261120   ;;  %v43_v1 = vld [vmem:[#allocation2] sm:$0xff] }
  0x26   :  { %38 = vrot.lane.b32.xlu0 %v36_v0, %s141_s4  ;;  %s142_s5 = smov [#allocation7]   ;;  %vm45_vm1 = vcmask 523264  }
  0x27   :  { %s53_s6 = sshll.u32 %s142_s5, 4  ;;  %s54_s6 = int_to_ptr.vmem [resolvable:$true] %s53_s6 }
  0x28   :  { %s111_s7 = scalar_lea.vmem %s54_s6, 128  ;;  %p116_p3 = scmp.lt.s32.totalorder %s54_s6, %s54_s6 }
  0x29   :  { %p112_p2 = scmp.ne.s32.totalorder %s54_s6, %s111_s7  ;;  %p117_p4 = scmp.lt.s32.totalorder %s111_s7, %s111_s7 }
  0x2b   :  { %p118_p5 = por %p117_p4, %p116_p3 }
  0x2d   :  { %p119_p6 = pnand %p118_p5, %p112_p2 }
  0x98   :  { %v39_v2 = vpop.permute.xlu0 %38 }
  0x99   :  { %v42_v3 = vsel %vm41_vm0, %v36_v0, %v39_v2 }
  0x9a   :  { %v44_v4 = vadd.f32 %v43_v1, %v42_v3 }
  0x9c   :  { %46 = vst.msk [vmem:[#allocation7] sm:$0xff] %vm45_vm1, %v44_v4 }
  0x9d   :  { %122 = shalt.err (!%p119_p6)
}
  0x9e   :  { %s123_s9 = scalar_lea.hbm %s196_s2, 128 }
  0x9f   :  { %p124_p7 = scmp.ne.s32.totalorder %s196_s2, %s123_s9  ;;  %p127_p8 = scmp.lt.u32.totalorder %s123_s9, %s196_s2 }
  0xa1   :  { %p129_p9 = pnand %p127_p8, %p124_p7 }
  0xa3   :  { %132 = shalt.err (!%p129_p9)
}
  0xa4   :  { %56 = dma.vmem_to_hbm [thread:$0]  %s54_s6, 128, %s196_s2, [#allocation4]  }
  0xa5   :  { %137 = dma.done.wait [#allocation4], 128  }
  0xa6   :  { %138 = vsyncadd [#allocation4], 4294967168 }
  0xa7   :  { %60 = vsyncpa [#allocation3], 1 }
  0xa8   :  { %61 = vsyncpa [#allocation6], 1 }
  0xa9   :  { %62 = vsyncpa [#allocation4], 1 }

</bundles_post_ra>
